<compile_context>
chip_gen: v5e
topology: v5e:2x2
jax: 0.10.0
libtpu: 0.0.40
codegen_flags: <defaults>
</compile_context>

<pallas_src>
import jax
import jax.numpy as jnp
from jax.experimental import pallas as pl
from jax.experimental.pallas import tpu as pltpu

LANE = 128          # lane width: pad weight/activation feature dims to this
TB_LARGE = 512      # batch-tile (rows per grid step) for large batches


def _round_up(n, m):
    return ((n + m - 1) // m) * m


# ----------------------------------------------------------------------------
# Pallas kernel: fused 4-layer MLP (Linear+ReLU x3, Linear) on one batch tile
#   x_ref : [TB, D_in]      (logical input width, not lane-padded)
#   w1_ref: [D_in, Wp]      (lane-padded output width)
#   w_ref : [3, Wp, Wp]     (packed, zero-padded w2 / w3 / w4)
#   b_ref : [4, Wp]         (packed, zero-padded b1 / b2 / b3 / b4)
#   o_ref : [TB, Wp]        (lane-dense output; sliced to D_out in wrapper)
# ----------------------------------------------------------------------------
def mlp_kernel(x_ref, w1_ref, w_ref, b_ref, o_ref):
    x = x_ref[...]

    h = jnp.dot(x, w1_ref[...], preferred_element_type=jnp.float32)
    h = jnp.maximum(h + b_ref[0:1, :], 0.0)

    h = jnp.dot(h, w_ref[0], preferred_element_type=jnp.float32)
    h = jnp.maximum(h + b_ref[1:2, :], 0.0)

    h = jnp.dot(h, w_ref[1], preferred_element_type=jnp.float32)
    h = jnp.maximum(h + b_ref[2:3, :], 0.0)

    out = jnp.dot(h, w_ref[2], preferred_element_type=jnp.float32)
    o_ref[...] = out + b_ref[3:4, :]


# ----------------------------------------------------------------------------
# Wrapper: pad batch only, pick no-grid vs batch-tiled grid, slice result back
# ----------------------------------------------------------------------------
def net_forward(x_flat, padded_params, d_out, tb_large=TB_LARGE):
    """x_flat: [B, D_in] float32.  padded_params: packed lane-padded weights."""
    B, d_in = x_flat.shape
    wp = padded_params["b_stack"].shape[-1]
    w_args = (padded_params["w1"], padded_params["w_stack"],
              padded_params["b_stack"])

    if B <= tb_large:
        # Small batch: one whole-array block, no grid.  Batch rounded only to
        # the sublane multiple (8), input lanes untouched.
        bp = _round_up(max(B, 1), 8)
        x_in = (x_flat if bp == B else
                jnp.zeros((bp, d_in), x_flat.dtype).at[:B].set(x_flat))
        out_pad = pl.pallas_call(
            mlp_kernel,
            out_shape=jax.ShapeDtypeStruct((bp, wp), jnp.float32),
        )(x_in, *w_args)
    else:
        # Large batch: tile the batch axis (TB=512), double-buffer the
        # activation stream, keep the (tiny) weights resident & single-buffered.
        bp = _round_up(B, tb_large)
        x_in = (x_flat if bp == B else
                jnp.zeros((bp, d_in), x_flat.dtype).at[:B].set(x_flat))

        def resident(arr):
            # constant index_map -> stays in VMEM; Buffered(1): no useless
            # second buffer / DMA bookkeeping for never-changing blocks.
            return pl.BlockSpec(arr.shape,
                                lambda i, _nd=arr.ndim: (0,) * _nd,
                                pipeline_mode=pl.Buffered(1))

        out_pad = pl.pallas_call(
            mlp_kernel,
            out_shape=jax.ShapeDtypeStruct((bp, wp), jnp.float32),
            grid_spec=pl.GridSpec(
                grid=(bp // tb_large,),
                in_specs=[pl.BlockSpec((tb_large, d_in), lambda i: (i, 0))]
                         + [resident(a) for a in w_args],
                out_specs=pl.BlockSpec((tb_large, wp), lambda i: (i, 0)),
            ),
            compiler_params=pltpu.CompilerParams(
                dimension_semantics=("parallel",)),  # v7x: shard batch over 2 TCs
        )(x_in, *w_args)

    return out_pad[:B, :d_out]


# ----------------------------------------------------------------------------
# Parameter construction (deterministic) + spectral normalization (glue)
# ----------------------------------------------------------------------------
def _linear_init(key, fan_in, fan_out):
    # PyTorch nn.Linear default: U(-1/sqrt(fan_in), 1/sqrt(fan_in))
    kw, kb = jax.random.split(key)
    bound = 1.0 / jnp.sqrt(fan_in)
    w = jax.random.uniform(kw, (fan_out, fan_in), jnp.float32, -bound, bound)
    b = jax.random.uniform(kb, (fan_out,), jnp.float32, -bound, bound)
    return w, b


def _spectral_normalize(key, w, n_power_iterations=1, eps=1e-12):
    """Mirror torch.nn.utils.spectral_norm forward (1 power iteration).

    Note: torch persists `u` as a buffer across calls; here a fresh `u` is
    drawn once at setup, which matches a single forward pass of a freshly
    constructed module.
    """
    out_dim, _ = w.shape
    u = jax.random.normal(key, (out_dim,), jnp.float32)
    u = u / (jnp.linalg.norm(u) + eps)
    v = None
    for _ in range(n_power_iterations):
        v = w.T @ u
        v = v / (jnp.linalg.norm(v) + eps)
        u = w @ v
        u = u / (jnp.linalg.norm(u) + eps)
    sigma = u @ (w @ v)
    return w / sigma


def _pad_2d(a, rows, cols):
    out = jnp.zeros((rows, cols), a.dtype)
    return out.at[: a.shape[0], : a.shape[1]].set(a)


def make_params(key, d_in, h, d_out):
    keys = jax.random.split(key, 8)
    w1, b1 = _linear_init(keys[0], d_in, h)
    w2, b2 = _linear_init(keys[1], h, h)
    w3, b3 = _linear_init(keys[2], h, h)
    w4, b4 = _linear_init(keys[3], h, d_out)

    w1 = _spectral_normalize(keys[4], w1)
    w2 = _spectral_normalize(keys[5], w2)
    w3 = _spectral_normalize(keys[6], w3)
    # last Linear has no spectral norm

    # logical (unpadded) params, transposed to [in, out]; biases as [1, out]
    raw = {
        "w1": w1.T, "b1": b1[None, :],
        "w2": w2.T, "b2": b2[None, :],
        "w3": w3.T, "b3": b3[None, :],
        "w4": w4.T, "b4": b4[None, :],
    }

    # Single lane-padded width for all hidden/output activations.  Zero
    # padding of weights/biases + ReLU(0)=0 keeps numerics identical; the
    # wrapper slices the output back to D_out.
    wp = max(_round_up(h, LANE), _round_up(d_out, LANE))

    w1_p = _pad_2d(raw["w1"], d_in, wp)                 # input lanes NOT padded
    w_stack = jnp.stack([_pad_2d(raw["w2"], wp, wp),
                         _pad_2d(raw["w3"], wp, wp),
                         _pad_2d(raw["w4"], wp, wp)])   # [3, Wp, Wp]
    b_stack = jnp.concatenate([_pad_2d(raw["b1"], 1, wp),
                               _pad_2d(raw["b2"], 1, wp),
                               _pad_2d(raw["b3"], 1, wp),
                               _pad_2d(raw["b4"], 1, wp)], axis=0)  # [4, Wp]

    padded = {"w1": w1_p, "w_stack": w_stack, "b_stack": b_stack}
    return raw, padded


# ----------------------------------------------------------------------------
if __name__ == "__main__":
    D_in, H, D_out = 16, 32, 8

    key = jax.random.PRNGKey(0)
    kx, kp = jax.random.split(key)

    # small NCHW-ish input; forward flattens to (-1, D_in) like x.view(-1, D_in)
    x = jax.random.normal(kx, (2, 4, 16, 16), jnp.float32)   # 2*4*16 = 128 rows
    x_flat = x.reshape(-1, D_in)

    raw_params, padded_params = make_params(kp, D_in, H, D_out)

    out = net_forward(x_flat, padded_params, D_out)
    out = jax.block_until_ready(out)

    # reference check in plain JAX using the unpadded parameters
    def ref(xf, p):
        h = jnp.maximum(xf @ p["w1"] + p["b1"], 0.0)
        h = jnp.maximum(h @ p["w2"] + p["b2"], 0.0)
        h = jnp.maximum(h @ p["w3"] + p["b3"], 0.0)
        return h @ p["w4"] + p["b4"]

    expected = ref(x_flat, raw_params)
    assert out.shape == (x_flat.shape[0], D_out)
    assert jnp.allclose(out, expected, atol=1e-4, rtol=1e-4)

    print("KERNEL_OK")
</pallas_src>

<mosaic_0001>
module attributes {stable_mosaic.version = 11 : i64} {
  func.func @mlp_kernel(%arg0: memref<128x16xf32, #tpu.memory_space<vmem>>, %arg1: memref<16x128xf32, #tpu.memory_space<vmem>>, %arg2: memref<3x128x128xf32, #tpu.memory_space<vmem>>, %arg3: memref<4x128xf32, #tpu.memory_space<vmem>>, %arg4: memref<128x128xf32, #tpu.memory_space<vmem>>) attributes {dimension_semantics = [], scalar_prefetch = 0 : i64, scratch_operands = 0 : i64, tpu.core_type = #tpu.core_type<tc>} {
    %c0 = arith.constant 0 : index
    %c0_0 = arith.constant 0 : index
    %0 = vector.load %arg0[%c0, %c0_0] : memref<128x16xf32, #tpu.memory_space<vmem>>, vector<128x16xf32>
    %c0_1 = arith.constant 0 : index
    %c0_2 = arith.constant 0 : index
    %1 = vector.load %arg1[%c0_1, %c0_2] : memref<16x128xf32, #tpu.memory_space<vmem>>, vector<16x128xf32>
    %cst = arith.constant dense<0.000000e+00> : vector<128x128xf32>
    %2 = tpu.matmul %0, %1, %cst {dimension_numbers = #tpu.dot_dimension_numbers<[1], [0], [0], [1], [0, 0, 1, 1], [], []>} : vector<128x16xf32>, vector<16x128xf32>, vector<128x128xf32> -> vector<128x128xf32>
    %c0_3 = arith.constant 0 : index
    %c0_4 = arith.constant 0 : index
    %3 = vector.load %arg3[%c0_3, %c0_4] : memref<4x128xf32, #tpu.memory_space<vmem>>, vector<1x128xf32>
    %4 = vector.broadcast %3 : vector<1x128xf32> to vector<128x128xf32>
    %5 = arith.addf %2, %4 : vector<128x128xf32>
    %cst_5 = arith.constant 0.000000e+00 : f32
    %6 = vector.broadcast %cst_5 : f32 to vector<128x128xf32>
    %7 = arith.maximumf %5, %6 : vector<128x128xf32>
    %c0_6 = arith.constant 0 : index
    %c0_7 = arith.constant 0 : index
    %c0_8 = arith.constant 0 : index
    %8 = vector.load %arg2[%c0_6, %c0_7, %c0_8] : memref<3x128x128xf32, #tpu.memory_space<vmem>>, vector<1x128x128xf32>
    %9 = vector.shape_cast %8 : vector<1x128x128xf32> to vector<128x128xf32>
    %cst_9 = arith.constant dense<0.000000e+00> : vector<128x128xf32>
    %10 = tpu.matmul %7, %9, %cst_9 {dimension_numbers = #tpu.dot_dimension_numbers<[1], [0], [0], [1], [0, 0, 1, 1], [], []>} : vector<128x128xf32>, vector<128x128xf32>, vector<128x128xf32> -> vector<128x128xf32>
    %c1 = arith.constant 1 : index
    %c0_10 = arith.constant 0 : index
    %11 = vector.load %arg3[%c1, %c0_10] : memref<4x128xf32, #tpu.memory_space<vmem>>, vector<1x128xf32>
    %12 = vector.broadcast %11 : vector<1x128xf32> to vector<128x128xf32>
    %13 = arith.addf %10, %12 : vector<128x128xf32>
    %cst_11 = arith.constant 0.000000e+00 : f32
    %14 = vector.broadcast %cst_11 : f32 to vector<128x128xf32>
    %15 = arith.maximumf %13, %14 : vector<128x128xf32>
    %c1_12 = arith.constant 1 : index
    %c0_13 = arith.constant 0 : index
    %c0_14 = arith.constant 0 : index
    %16 = vector.load %arg2[%c1_12, %c0_13, %c0_14] : memref<3x128x128xf32, #tpu.memory_space<vmem>>, vector<1x128x128xf32>
    %17 = vector.shape_cast %16 : vector<1x128x128xf32> to vector<128x128xf32>
    %cst_15 = arith.constant dense<0.000000e+00> : vector<128x128xf32>
    %18 = tpu.matmul %15, %17, %cst_15 {dimension_numbers = #tpu.dot_dimension_numbers<[1], [0], [0], [1], [0, 0, 1, 1], [], []>} : vector<128x128xf32>, vector<128x128xf32>, vector<128x128xf32> -> vector<128x128xf32>
    %c2 = arith.constant 2 : index
    %c0_16 = arith.constant 0 : index
    %19 = vector.load %arg3[%c2, %c0_16] : memref<4x128xf32, #tpu.memory_space<vmem>>, vector<1x128xf32>
    %20 = vector.broadcast %19 : vector<1x128xf32> to vector<128x128xf32>
    %21 = arith.addf %18, %20 : vector<128x128xf32>
    %cst_17 = arith.constant 0.000000e+00 : f32
    %22 = vector.broadcast %cst_17 : f32 to vector<128x128xf32>
    %23 = arith.maximumf %21, %22 : vector<128x128xf32>
    %c2_18 = arith.constant 2 : index
    %c0_19 = arith.constant 0 : index
    %c0_20 = arith.constant 0 : index
    %24 = vector.load %arg2[%c2_18, %c0_19, %c0_20] : memref<3x128x128xf32, #tpu.memory_space<vmem>>, vector<1x128x128xf32>
    %25 = vector.shape_cast %24 : vector<1x128x128xf32> to vector<128x128xf32>
    %cst_21 = arith.constant dense<0.000000e+00> : vector<128x128xf32>
    %26 = tpu.matmul %23, %25, %cst_21 {dimension_numbers = #tpu.dot_dimension_numbers<[1], [0], [0], [1], [0, 0, 1, 1], [], []>} : vector<128x128xf32>, vector<128x128xf32>, vector<128x128xf32> -> vector<128x128xf32>
    %c3 = arith.constant 3 : index
    %c0_22 = arith.constant 0 : index
    %27 = vector.load %arg3[%c3, %c0_22] : memref<4x128xf32, #tpu.memory_space<vmem>>, vector<1x128xf32>
    %28 = vector.broadcast %27 : vector<1x128xf32> to vector<128x128xf32>
    %29 = arith.addf %26, %28 : vector<128x128xf32>
    %c0_23 = arith.constant 0 : index
    %c0_24 = arith.constant 0 : index
    %30 = vector.load %arg4[%c0_23, %c0_24] : memref<128x128xf32, #tpu.memory_space<vmem>>, vector<128x128xf32>
    tpu.vector_store %arg4[%c0_23, %c0_24], %29 {strides = array<i32>} : memref<128x128xf32, #tpu.memory_space<vmem>>, vector<128x128xf32>,
    return
  }
}

</mosaic_0001>

<bundles_post_ra>
// kernel: tpu_custom_call.1
= control target key start
LH: loop header
LB: loop body
LE: loop exit
PB: predicated region body
PF: predicated region fallthrough
CT: control target
= control target key end

     0   :  { %9 = vsyncpa [#allocation3], 0  ;;  %s737_s0 = inlined_call_operand.vmem [shape: f32[128,16], index: 0, kind: input, shape index: {}]   ;;  %s738_s1 = inlined_call_operand.vmem [shape: f32[16,128], index: 1, kind: input, shape index: {}]   ;;  %s739_s2 = inlined_call_operand.hbm [shape: f32[3,128,128], index: 2, kind: input, shape index: {}]   ;;  %s740_s3 = inlined_call_operand.vmem [shape: f32[4,128], index: 3, kind: input, shape index: {}]   ;;  %s741_s4 = inlined_call_operand.hbm [shape: f32[128,128], index: 4, kind: output, shape index: {}]  }
   0x1   :  { %10 = vsyncpa [#allocation4], 0  ;;  %s19_s17 = sshll.u32 %s739_s2, 4  ;;  %s578_s18 = smov [#allocation2]   ;;  %s20_s17 = int_to_ptr.hbm [resolvable:$true] %s19_s17 }
   0x2   :  { %s21_s19 = sshll.u32 %s578_s18, 4  ;;  %s579_s20 = smov 128   ;;  %s22_s19 = int_to_ptr.vmem [resolvable:$true] %s21_s19 }
   0x3   :  { %s580_s21 = smov 8  }
   0x4   :  { %27 = dma.hbm_to_vmem [thread:$0]  %s20_s17, 6144, %s22_s19, [#allocation3], %s579_s20, %s579_s20, %s580_s21  }
   0x5   :  { %574 = dma.done.wait [#allocation3], 6144  }
   0x6   :  { %575 = vsyncadd [#allocation3], 4294961152  ;;  %v51_v0 = vld [vmem:[%s738_s1 + $0x8] sm:$0xff]  ;;  %v50_v1 = vld [vmem:[%s738_s1] sm:$0xff]  ;;  %vm54_vm0 = vcmask 130048   ;;  %s489_s14 = sshll.u32 %s741_s4, 4  ;;  %s490_s14 = int_to_ptr.hbm [resolvable:$true] %s489_s14 }
   0x7   :  { %117 = vmatpush.msra.mxu0 %v51_v0  ;;  %v34_v2 = vld [vmem:[%s737_s0] sm:$0xff]  ;;  %v35_v3 = vld [vmem:[%s737_s0 + $0x8] sm:$0xff]  ;;  %v36_v4 = vld [vmem:[%s737_s0 + $0x10] sm:$0xff] }
   0x8   :  { %v37_v5 = vld [vmem:[%s737_s0 + $0x18] sm:$0xff]  ;;  %v38_v6 = vld [vmem:[%s737_s0 + $0x20] sm:$0xff]  ;;  %v39_v7 = vld [vmem:[%s737_s0 + $0x28] sm:$0xff] }
   0x9   :  { %118 = vmatpush.msra.mxu0 %v50_v1  ;;  %v40_v8 = vld [vmem:[%s737_s0 + $0x30] sm:$0xff]  ;;  %v41_v9 = vld [vmem:[%s737_s0 + $0x38] sm:$0xff]  ;;  %v42_v10 = vld [vmem:[%s737_s0 + $0x40] sm:$0xff] }
   0xa   :  { %502 = vmatmul.msk.f32.vlgmr.msra.gmra.mxu0 %vm54_vm0, %v34_v2  ;;  %v199_v11 = vld [vmem:[#allocation2 + $0x78] sm:$0xff]  ;;  %v198_v12 = vld [vmem:[#allocation2 + $0x70] sm:$0xff]  ;;  %v197_v13 = vld [vmem:[#allocation2 + $0x68] sm:$0xff] }
   0xb   :  { %202 = vmatpush.msra.mxu1 %v199_v11  ;;  %v43_v14 = vld [vmem:[%s737_s0 + $0x48] sm:$0xff]  ;;  %v196_v15 = vld [vmem:[#allocation2 + $0x60] sm:$0xff]  ;;  %v195_v16 = vld [vmem:[#allocation2 + $0x58] sm:$0xff] }
   0xc   :  { %v194_v17 = vld [vmem:[#allocation2 + $0x50] sm:$0xff]  ;;  %v193_v18 = vld [vmem:[#allocation2 + $0x48] sm:$0xff]  ;;  %v192_v20 = vld [vmem:[#allocation2 + $0x40] sm:$0xff] }
   0xd   :  { %203 = vmatpush.msra.mxu1 %v198_v12  ;;  %v44_v19 = vld [vmem:[%s737_s0 + $0x50] sm:$0xff]  ;;  %v191_v21 = vld [vmem:[#allocation2 + $0x38] sm:$0xff]  ;;  %v189_v23 = vld [vmem:[#allocation2 + $0x28] sm:$0xff] }
   0xe   :  { %v190_v22 = vld [vmem:[#allocation2 + $0x30] sm:$0xff]  ;;  %v45_v24 = vld [vmem:[%s737_s0 + $0x58] sm:$0xff]  ;;  %v188_v25 = vld [vmem:[#allocation2 + $0x20] sm:$0xff] }
   0xf   :  { %204 = vmatpush.msra.mxu1 %v197_v13  ;;  %v187_v26 = vld [vmem:[#allocation2 + $0x18] sm:$0xff]  ;;  %v186_v27 = vld [vmem:[#allocation2 + $0x10] sm:$0xff]  ;;  %v46_v28 = vld [vmem:[%s737_s0 + $0x60] sm:$0xff] }
  0x10   :  { %v185_v29 = vld [vmem:[#allocation2 + $0x8] sm:$0xff]  ;;  %v184_v30 = vld [vmem:[#allocation2] sm:$0xff]  ;;  %v48_v32 = vld [vmem:[%s737_s0 + $0x70] sm:$0xff] }
  0x11   :  { %205 = vmatpush.msra.mxu1 %v196_v15  ;;  %v47_v31 = vld [vmem:[%s737_s0 + $0x68] sm:$0xff]  ;;  %v49_v33 = vld [vmem:[%s737_s0 + $0x78] sm:$0xff]  ;;  %v686_v34 = vld [vmem:[%s740_s3] ss:$0 sm:$0xff] }
  0x12   :  { %503 = vmatmul.msk.f32.gmra.mxu0 %vm54_vm0, %v35_v3  ;;  %v299_v62 = vld [vmem:[#allocation2 + $0xf8] sm:$0xff]  ;;  %v298_v1 = vld [vmem:[#allocation2 + $0xf0] sm:$0xff]  ;;  %v297_v3 = vld [vmem:[#allocation2 + $0xe8] sm:$0xff] }
  0x13   :  { %206 = vmatpush.msra.mxu1 %v195_v16  ;;  %302 = vmatpush.msra.mxu2 %v299_v62  ;;  %v292_v11 = vld [vmem:[#allocation2 + $0xc0] sm:$0xff]  ;;  %v291_v12 = vld [vmem:[#allocation2 + $0xb8] sm:$0xff]  ;;  %v290_v15 = vld [vmem:[#allocation2 + $0xb0] sm:$0xff] }
  0x15   :  { %207 = vmatpush.msra.mxu1 %v194_v17  ;;  %303 = vmatpush.msra.mxu2 %v298_v1  ;;  %v289_v17 = vld [vmem:[#allocation2 + $0xa8] sm:$0xff] }
  0x17   :  { %208 = vmatpush.msra.mxu1 %v193_v18  ;;  %304 = vmatpush.msra.mxu2 %v297_v3  ;;  %v288_v18 = vld [vmem:[#allocation2 + $0xa0] sm:$0xff]  ;;  %v398_v3 = vld [vmem:[#allocation2 + $0x170] sm:$0xff] }
  0x19   :  { %209 = vmatpush.msra.mxu1 %v192_v20 }
  0x1a   :  { %504 = vmatmul.msk.f32.gmra.mxu0 %vm54_vm0, %v36_v4  ;;  %v296_v4 = vld [vmem:[#allocation2 + $0xe0] sm:$0xff] }
  0x1b   :  { %210 = vmatpush.msra.mxu1 %v191_v21  ;;  %305 = vmatpush.msra.mxu2 %v296_v4 }
  0x1d   :  { %211 = vmatpush.msra.mxu1 %v190_v22  ;;  %v286_v22 = vld [vmem:[#allocation2 + $0x90] sm:$0xff] }
  0x1f   :  { %212 = vmatpush.msra.mxu1 %v189_v23 }
  0x21   :  { %213 = vmatpush.msra.mxu1 %v188_v25  ;;  %v284_v25 = vld [vmem:[#allocation2 + $0x80] sm:$0xff] }
  0x22   :  { %505 = vmatmul.msk.f32.gmra.mxu0 %vm54_vm0, %v37_v5  ;;  %v295_v5 = vld [vmem:[#allocation2 + $0xd8] sm:$0xff] }
  0x23   :  { %214 = vmatpush.msra.mxu1 %v187_v26  ;;  %306 = vmatpush.msra.mxu2 %v295_v5 }
  0x25   :  { %215 = vmatpush.msra.mxu1 %v186_v27 }
  0x27   :  { %216 = vmatpush.msra.mxu1 %v185_v29 }
  0x29   :  { %217 = vmatpush.msra.mxu1 %v184_v30 }
  0x2a   :  { %506 = vmatmul.msk.f32.gmra.mxu0 %vm54_vm0, %v38_v6 }
  0x32   :  { %507 = vmatmul.msk.f32.gmra.mxu0 %vm54_vm0, %v39_v7 }
  0x3a   :  { %508 = vmatmul.msk.f32.gmra.mxu0 %vm54_vm0, %v40_v8  ;;  %v294_v8 = vld [vmem:[#allocation2 + $0xd0] sm:$0xff] }
  0x3b   :  { %307 = vmatpush.msra.mxu2 %v294_v8  ;;  %v396_v8 = vld [vmem:[#allocation2 + $0x160] sm:$0xff] }
  0x42   :  { %509 = vmatmul.msk.f32.gmra.mxu0 %vm54_vm0, %v41_v9 }
  0x4a   :  { %510 = vmatmul.msk.f32.gmra.mxu0 %vm54_vm0, %v42_v10  ;;  %v293_v10 = vld [vmem:[#allocation2 + $0xc8] sm:$0xff] }
  0x4b   :  { %308 = vmatpush.msra.mxu2 %v293_v10  ;;  %v394_v10 = vld [vmem:[#allocation2 + $0x150] sm:$0xff] }
  0x4d   :  { %309 = vmatpush.msra.mxu2 %v292_v11 }
  0x4f   :  { %310 = vmatpush.msra.mxu2 %v291_v12 }
  0x51   :  { %311 = vmatpush.msra.mxu2 %v290_v15  ;;  %v392_v15 = vld [vmem:[#allocation2 + $0x140] sm:$0xff] }
  0x52   :  { %511 = vmatmul.msk.f32.gmra.mxu0 %vm54_vm0, %v43_v14 }
  0x53   :  { %312 = vmatpush.msra.mxu2 %v289_v17  ;;  %v390_v17 = vld [vmem:[#allocation2 + $0x130] sm:$0xff] }
  0x55   :  { %313 = vmatpush.msra.mxu2 %v288_v18  ;;  %v389_v18 = vld [vmem:[#allocation2 + $0x128] sm:$0xff] }
  0x5a   :  { %512 = vmatmul.msk.f32.gmra.mxu0 %vm54_vm0, %v44_v19  ;;  %v287_v19 = vld [vmem:[#allocation2 + $0x98] sm:$0xff] }
  0x5b   :  { %314 = vmatpush.msra.mxu2 %v287_v19 }
  0x5d   :  { %315 = vmatpush.msra.mxu2 %v286_v22 }
  0x62   :  { %513 = vmatmul.msk.f32.gmra.mxu0 %vm54_vm0, %v45_v24  ;;  %v285_v24 = vld [vmem:[#allocation2 + $0x88] sm:$0xff] }
  0x63   :  { %316 = vmatpush.msra.mxu2 %v285_v24  ;;  %v386_v24 = vld [vmem:[#allocation2 + $0x110] sm:$0xff] }
  0x65   :  { %317 = vmatpush.msra.mxu2 %v284_v25 }
  0x6a   :  { %514 = vmatmul.msk.f32.gmra.mxu0 %vm54_vm0, %v46_v28 }
  0x72   :  { %515 = vmatmul.msk.f32.gmra.mxu0 %vm54_vm0, %v47_v31 }
  0x7a   :  { %516 = vmatmul.msk.f32.gmra.mxu0 %vm54_vm0, %v48_v32 }
  0x82   :  { %517 = vmatmul.msk.f32.gmra.mxu0 %vm54_vm0, %v49_v33 }
  0x87   :  { %v120_v35 = vpop.f32.mrf.mxu0 }
  0x88   :  { %v121_v36 = vadd.f32 %v686_v34, %v120_v35 }
  0x8a   :  { %v168_v37 = vmax.f32 %v121_v36, 0.0  ;;  %v707_v36 = vld [vmem:[%s740_s3 + $0x1] ss:$0 sm:$0xff] }
  0x8c   :  { %218 = vmatmul.f32.vlgmr.msra.gmra.mxu1 %v168_v37 }
  0x8f   :  { %v123_v38 = vpop.f32.mrf.mxu0 }
  0x90   :  { %v124_v39 = vadd.f32 %v686_v34, %v123_v38 }
  0x92   :  { %v169_v40 = vmax.f32 %v124_v39, 0.0 }
  0x94   :  { %221 = vmatmul.f32.gmra.mxu1 %v169_v40 }
  0x97   :  { %v126_v41 = vpop.f32.mrf.mxu0 }
  0x98   :  { %v127_v42 = vadd.f32 %v686_v34, %v126_v41 }
  0x9a   :  { %v170_v43 = vmax.f32 %v127_v42, 0.0 }
  0x9c   :  { %224 = vmatmul.f32.gmra.mxu1 %v170_v43 }
  0x9f   :  { %v129_v44 = vpop.f32.mrf.mxu0 }
  0xa0   :  { %v130_v45 = vadd.f32 %v686_v34, %v129_v44 }
  0xa2   :  { %v171_v46 = vmax.f32 %v130_v45, 0.0 }
  0xa4   :  { %227 = vmatmul.f32.gmra.mxu1 %v171_v46 }
  0xa7   :  { %v132_v47 = vpop.f32.mrf.mxu0 }
  0xa8   :  { %v133_v48 = vadd.f32 %v686_v34, %v132_v47 }
  0xaa   :  { %v172_v49 = vmax.f32 %v133_v48, 0.0 }
  0xac   :  { %230 = vmatmul.f32.gmra.mxu1 %v172_v49 }
  0xaf   :  { %v135_v50 = vpop.f32.mrf.mxu0 }
  0xb0   :  { %v136_v51 = vadd.f32 %v686_v34, %v135_v50 }
  0xb2   :  { %v173_v52 = vmax.f32 %v136_v51, 0.0 }
  0xb4   :  { %233 = vmatmul.f32.gmra.mxu1 %v173_v52 }
  0xb7   :  { %v138_v53 = vpop.f32.mrf.mxu0 }
  0xb8   :  { %v139_v54 = vadd.f32 %v686_v34, %v138_v53 }
  0xba   :  { %v174_v55 = vmax.f32 %v139_v54, 0.0 }
  0xbc   :  { %236 = vmatmul.f32.gmra.mxu1 %v174_v55 }
  0xbf   :  { %v141_v56 = vpop.f32.mrf.mxu0 }
  0xc0   :  { %v142_v57 = vadd.f32 %v686_v34, %v141_v56 }
  0xc2   :  { %v175_v58 = vmax.f32 %v142_v57, 0.0 }
  0xc4   :  { %239 = vmatmul.f32.gmra.mxu1 %v175_v58 }
  0xc7   :  { %v144_v59 = vpop.f32.mrf.mxu0 }
  0xc8   :  { %v145_v60 = vadd.f32 %v686_v34, %v144_v59 }
  0xca   :  { %v176_v61 = vmax.f32 %v145_v60, 0.0 }
  0xcc   :  { %242 = vmatmul.f32.gmra.mxu1 %v176_v61 }
  0xcf   :  { %v147_v63 = vpop.f32.mrf.mxu0 }
  0xd0   :  { %v148_v0 = vadd.f32 %v686_v34, %v147_v63 }
  0xd2   :  { %v177_v2 = vmax.f32 %v148_v0, 0.0 }
  0xd4   :  { %245 = vmatmul.f32.gmra.mxu1 %v177_v2  ;;  %v399_v2 = vld [vmem:[#allocation2 + $0x178] sm:$0xff] }
  0xd5   :  { %402 = vmatpush.msra.mxu3 %v399_v2 }
  0xd7   :  { %v150_v6 = vpop.f32.mrf.mxu0  ;;  %403 = vmatpush.msra.mxu3 %v398_v3 }
  0xd8   :  { %v151_v7 = vadd.f32 %v686_v34, %v150_v6  ;;  %v397_v6 = vld [vmem:[#allocation2 + $0x168] sm:$0xff] }
  0xd9   :  { %404 = vmatpush.msra.mxu3 %v397_v6 }
  0xda   :  { %v178_v9 = vmax.f32 %v151_v7, 0.0 }
  0xdb   :  { %405 = vmatpush.msra.mxu3 %v396_v8 }
  0xdc   :  { %248 = vmatmul.f32.gmra.mxu1 %v178_v9  ;;  %v395_v9 = vld [vmem:[#allocation2 + $0x158] sm:$0xff] }
  0xdd   :  { %406 = vmatpush.msra.mxu3 %v395_v9 }
  0xdf   :  { %v153_v13 = vpop.f32.mrf.mxu0  ;;  %407 = vmatpush.msra.mxu3 %v394_v10 }
  0xe0   :  { %v154_v14 = vadd.f32 %v686_v34, %v153_v13  ;;  %v393_v13 = vld [vmem:[#allocation2 + $0x148] sm:$0xff] }
  0xe1   :  { %408 = vmatpush.msra.mxu3 %v393_v13 }
  0xe2   :  { %v179_v16 = vmax.f32 %v154_v14, 0.0 }
  0xe3   :  { %409 = vmatpush.msra.mxu3 %v392_v15 }
  0xe4   :  { %251 = vmatmul.f32.gmra.mxu1 %v179_v16  ;;  %v391_v16 = vld [vmem:[#allocation2 + $0x138] sm:$0xff] }
  0xe5   :  { %410 = vmatpush.msra.mxu3 %v391_v16 }
  0xe7   :  { %v156_v20 = vpop.f32.mrf.mxu0  ;;  %411 = vmatpush.msra.mxu3 %v390_v17 }
  0xe8   :  { %v157_v21 = vadd.f32 %v686_v34, %v156_v20 }
  0xe9   :  { %412 = vmatpush.msra.mxu3 %v389_v18 }
  0xea   :  { %v180_v23 = vmax.f32 %v157_v21, 0.0  ;;  %v388_v21 = vld [vmem:[#allocation2 + $0x120] sm:$0xff] }
  0xeb   :  { %413 = vmatpush.msra.mxu3 %v388_v21  ;;  %v525_v21 = vld [vmem:[%s740_s3 + $0x3] ss:$0 sm:$0xff] }
  0xec   :  { %254 = vmatmul.f32.gmra.mxu1 %v180_v23  ;;  %v387_v23 = vld [vmem:[#allocation2 + $0x118] sm:$0xff] }
  0xed   :  { %414 = vmatpush.msra.mxu3 %v387_v23 }
  0xef   :  { %v159_v26 = vpop.f32.mrf.mxu0  ;;  %415 = vmatpush.msra.mxu3 %v386_v24 }
  0xf0   :  { %v160_v27 = vadd.f32 %v686_v34, %v159_v26 }
  0xf2   :  { %v181_v28 = vmax.f32 %v160_v27, 0.0  ;;  %v385_v27 = vld [vmem:[#allocation2 + $0x108] sm:$0xff] }
  0xf3   :  { %416 = vmatpush.msra.mxu3 %v385_v27 }
  0xf4   :  { %257 = vmatmul.f32.gmra.mxu1 %v181_v28 }
  0xf7   :  { %v162_v29 = vpop.f32.mrf.mxu0 }
  0xf8   :  { %v163_v30 = vadd.f32 %v686_v34, %v162_v29  ;;  %v384_v29 = vld [vmem:[#allocation2 + $0x100] sm:$0xff] }
  0xf9   :  { %417 = vmatpush.msra.mxu3 %v384_v29 }
  0xfa   :  { %v182_v31 = vmax.f32 %v163_v30, 0.0 }
  0xfc   :  { %260 = vmatmul.f32.gmra.mxu1 %v182_v31 }
  0xff   :  { %v165_v32 = vpop.f32.mrf.mxu0 }
 0x100   :  { %v166_v33 = vadd.f32 %v686_v34, %v165_v32 }
 0x102   :  { %v183_v35 = vmax.f32 %v166_v33, 0.0 }
 0x104   :  { %263 = vmatmul.f32.gmra.mxu1 %v183_v35 }
 0x109   :  { %v219_v37 = vpop.f32.mrf.mxu1 }
 0x10a   :  { %v220_v38 = vadd.f32 %v707_v36, %v219_v37 }
 0x10c   :  { %v267_v39 = vmax.f32 %v220_v38, 0.0  ;;  %v524_v38 = vld [vmem:[%s740_s3 + $0x2] ss:$0 sm:$0xff]  ;;  %s581_s3 = smov [#allocation5]  }
 0x10d   :  { %s487_s11 = sshll.u32 %s581_s3, 4  ;;  %s488_s11 = int_to_ptr.vmem [resolvable:$true] %s487_s11 }
 0x10e   :  { %318 = vmatmul.f32.vlgmr.msra.gmra.mxu2 %v267_v39 }
 0x111   :  { %v222_v40 = vpop.f32.mrf.mxu1 }
 0x112   :  { %v223_v41 = vadd.f32 %v707_v36, %v222_v40 }
 0x114   :  { %v268_v42 = vmax.f32 %v223_v41, 0.0 }
 0x116   :  { %321 = vmatmul.f32.gmra.mxu2 %v268_v42 }
 0x119   :  { %v225_v43 = vpop.f32.mrf.mxu1 }
 0x11a   :  { %v226_v34 = vadd.f32 %v707_v36, %v225_v43 }
 0x11c   :  { %v269_v44 = vmax.f32 %v226_v34, 0.0 }
 0x11e   :  { %324 = vmatmul.f32.gmra.mxu2 %v269_v44 }
 0x121   :  { %v228_v45 = vpop.f32.mrf.mxu1 }
 0x122   :  { %v229_v46 = vadd.f32 %v707_v36, %v228_v45 }
 0x124   :  { %v270_v47 = vmax.f32 %v229_v46, 0.0 }
 0x126   :  { %327 = vmatmul.f32.gmra.mxu2 %v270_v47 }
 0x129   :  { %v231_v48 = vpop.f32.mrf.mxu1 }
 0x12a   :  { %v232_v49 = vadd.f32 %v707_v36, %v231_v48 }
 0x12c   :  { %v271_v50 = vmax.f32 %v232_v49, 0.0 }
 0x12e   :  { %330 = vmatmul.f32.gmra.mxu2 %v271_v50 }
 0x131   :  { %v234_v51 = vpop.f32.mrf.mxu1 }
 0x132   :  { %v235_v52 = vadd.f32 %v707_v36, %v234_v51 }
 0x134   :  { %v272_v53 = vmax.f32 %v235_v52, 0.0 }
 0x136   :  { %333 = vmatmul.f32.gmra.mxu2 %v272_v53 }
 0x139   :  { %v237_v54 = vpop.f32.mrf.mxu1 }
 0x13a   :  { %v238_v55 = vadd.f32 %v707_v36, %v237_v54 }
 0x13c   :  { %v273_v56 = vmax.f32 %v238_v55, 0.0 }
 0x13e   :  { %336 = vmatmul.f32.gmra.mxu2 %v273_v56 }
 0x141   :  { %v240_v57 = vpop.f32.mrf.mxu1 }
 0x142   :  { %v241_v58 = vadd.f32 %v707_v36, %v240_v57 }
 0x144   :  { %v274_v59 = vmax.f32 %v241_v58, 0.0 }
 0x146   :  { %339 = vmatmul.f32.gmra.mxu2 %v274_v59 }
 0x149   :  { %v243_v60 = vpop.f32.mrf.mxu1 }
 0x14a   :  { %v244_v61 = vadd.f32 %v707_v36, %v243_v60 }
 0x14c   :  { %v275_v62 = vmax.f32 %v244_v61, 0.0 }
 0x14e   :  { %342 = vmatmul.f32.gmra.mxu2 %v275_v62 }
 0x151   :  { %v246_v63 = vpop.f32.mrf.mxu1 }
 0x152   :  { %v247_v0 = vadd.f32 %v707_v36, %v246_v63 }
 0x154   :  { %v276_v1 = vmax.f32 %v247_v0, 0.0 }
 0x156   :  { %345 = vmatmul.f32.gmra.mxu2 %v276_v1 }
 0x159   :  { %v249_v4 = vpop.f32.mrf.mxu1 }
 0x15a   :  { %v250_v5 = vadd.f32 %v707_v36, %v249_v4 }
 0x15c   :  { %v277_v7 = vmax.f32 %v250_v5, 0.0 }
 0x15e   :  { %348 = vmatmul.f32.gmra.mxu2 %v277_v7 }
 0x161   :  { %v252_v11 = vpop.f32.mrf.mxu1 }
 0x162   :  { %v253_v12 = vadd.f32 %v707_v36, %v252_v11 }
 0x164   :  { %v278_v14 = vmax.f32 %v253_v12, 0.0 }
 0x166   :  { %351 = vmatmul.f32.gmra.mxu2 %v278_v14 }
 0x169   :  { %v255_v19 = vpop.f32.mrf.mxu1 }
 0x16a   :  { %v256_v20 = vadd.f32 %v707_v36, %v255_v19 }
 0x16c   :  { %v279_v22 = vmax.f32 %v256_v20, 0.0 }
 0x16e   :  { %354 = vmatmul.f32.gmra.mxu2 %v279_v22 }
 0x171   :  { %v258_v25 = vpop.f32.mrf.mxu1 }
 0x172   :  { %v259_v26 = vadd.f32 %v707_v36, %v258_v25 }
 0x174   :  { %v280_v28 = vmax.f32 %v259_v26, 0.0 }
 0x176   :  { %357 = vmatmul.f32.gmra.mxu2 %v280_v28 }
 0x179   :  { %v261_v30 = vpop.f32.mrf.mxu1 }
 0x17a   :  { %v262_v31 = vadd.f32 %v707_v36, %v261_v30 }
 0x17c   :  { %v281_v32 = vmax.f32 %v262_v31, 0.0 }
 0x17e   :  { %360 = vmatmul.f32.gmra.mxu2 %v281_v32 }
 0x181   :  { %v264_v33 = vpop.f32.mrf.mxu1 }
 0x182   :  { %v265_v35 = vadd.f32 %v707_v36, %v264_v33 }
 0x184   :  { %v282_v37 = vmax.f32 %v265_v35, 0.0 }
 0x186   :  { %363 = vmatmul.f32.gmra.mxu2 %v282_v37 }
 0x191   :  { %v319_v39 = vpop.f32.mrf.mxu2 }
 0x192   :  { %v320_v40 = vadd.f32 %v524_v38, %v319_v39 }
 0x194   :  { %v367_v41 = vmax.f32 %v320_v40, 0.0 }
 0x196   :  { %418 = vmatmul.f32.vlgmr.msra.gmra.mxu3 %v367_v41 }
 0x199   :  { %v322_v42 = vpop.f32.mrf.mxu2 }
 0x19a   :  { %v323_v43 = vadd.f32 %v524_v38, %v322_v42 }
 0x19c   :  { %v368_v34 = vmax.f32 %v323_v43, 0.0 }
 0x19e   :  { %421 = vmatmul.f32.gmra.mxu3 %v368_v34 }
 0x1a1   :  { %v325_v44 = vpop.f32.mrf.mxu2 }
 0x1a2   :  { %v326_v45 = vadd.f32 %v524_v38, %v325_v44 }
 0x1a4   :  { %v369_v46 = vmax.f32 %v326_v45, 0.0 }
 0x1a6   :  { %424 = vmatmul.f32.gmra.mxu3 %v369_v46 }
 0x1a9   :  { %v328_v47 = vpop.f32.mrf.mxu2 }
 0x1aa   :  { %v329_v36 = vadd.f32 %v524_v38, %v328_v47 }
 0x1ac   :  { %v370_v48 = vmax.f32 %v329_v36, 0.0 }
 0x1ae   :  { %427 = vmatmul.f32.gmra.mxu3 %v370_v48 }
 0x1b1   :  { %v331_v49 = vpop.f32.mrf.mxu2 }
 0x1b2   :  { %v332_v50 = vadd.f32 %v524_v38, %v331_v49 }
 0x1b4   :  { %v371_v51 = vmax.f32 %v332_v50, 0.0 }
 0x1b6   :  { %430 = vmatmul.f32.gmra.mxu3 %v371_v51 }
 0x1b9   :  { %v334_v52 = vpop.f32.mrf.mxu2 }
 0x1ba   :  { %v335_v53 = vadd.f32 %v524_v38, %v334_v52 }
 0x1bc   :  { %v372_v54 = vmax.f32 %v335_v53, 0.0 }
 0x1be   :  { %433 = vmatmul.f32.gmra.mxu3 %v372_v54 }
 0x1c1   :  { %v337_v55 = vpop.f32.mrf.mxu2 }
 0x1c2   :  { %v338_v56 = vadd.f32 %v524_v38, %v337_v55 }
 0x1c4   :  { %v373_v57 = vmax.f32 %v338_v56, 0.0 }
 0x1c6   :  { %436 = vmatmul.f32.gmra.mxu3 %v373_v57 }
 0x1c9   :  { %v340_v58 = vpop.f32.mrf.mxu2 }
 0x1ca   :  { %v341_v59 = vadd.f32 %v524_v38, %v340_v58 }
 0x1cc   :  { %v374_v60 = vmax.f32 %v341_v59, 0.0 }
 0x1ce   :  { %439 = vmatmul.f32.gmra.mxu3 %v374_v60 }
 0x1d1   :  { %v343_v61 = vpop.f32.mrf.mxu2 }
 0x1d2   :  { %v344_v62 = vadd.f32 %v524_v38, %v343_v61 }
 0x1d4   :  { %v375_v63 = vmax.f32 %v344_v62, 0.0 }
 0x1d6   :  { %442 = vmatmul.f32.gmra.mxu3 %v375_v63 }
 0x1d9   :  { %v346_v0 = vpop.f32.mrf.mxu2 }
 0x1da   :  { %v347_v1 = vadd.f32 %v524_v38, %v346_v0 }
 0x1dc   :  { %v376_v2 = vmax.f32 %v347_v1, 0.0 }
 0x1de   :  { %445 = vmatmul.f32.gmra.mxu3 %v376_v2 }
 0x1e1   :  { %v349_v3 = vpop.f32.mrf.mxu2 }
 0x1e2   :  { %v350_v4 = vadd.f32 %v524_v38, %v349_v3 }
 0x1e4   :  { %v377_v5 = vmax.f32 %v350_v4, 0.0 }
 0x1e6   :  { %448 = vmatmul.f32.gmra.mxu3 %v377_v5 }
 0x1e9   :  { %v352_v6 = vpop.f32.mrf.mxu2 }
 0x1ea   :  { %v353_v7 = vadd.f32 %v524_v38, %v352_v6 }
 0x1ec   :  { %v378_v8 = vmax.f32 %v353_v7, 0.0 }
 0x1ee   :  { %451 = vmatmul.f32.gmra.mxu3 %v378_v8 }
 0x1f1   :  { %v355_v9 = vpop.f32.mrf.mxu2 }
 0x1f2   :  { %v356_v10 = vadd.f32 %v524_v38, %v355_v9 }
 0x1f4   :  { %v379_v11 = vmax.f32 %v356_v10, 0.0 }
 0x1f6   :  { %454 = vmatmul.f32.gmra.mxu3 %v379_v11 }
 0x1f9   :  { %v358_v12 = vpop.f32.mrf.mxu2 }
 0x1fa   :  { %v359_v13 = vadd.f32 %v524_v38, %v358_v12 }
 0x1fc   :  { %v380_v14 = vmax.f32 %v359_v13, 0.0 }
 0x1fe   :  { %457 = vmatmul.f32.gmra.mxu3 %v380_v14 }
 0x201   :  { %v361_v15 = vpop.f32.mrf.mxu2 }
 0x202   :  { %v362_v16 = vadd.f32 %v524_v38, %v361_v15 }
 0x204   :  { %v381_v17 = vmax.f32 %v362_v16, 0.0 }
 0x206   :  { %460 = vmatmul.f32.gmra.mxu3 %v381_v17 }
 0x209   :  { %v364_v18 = vpop.f32.mrf.mxu2 }
 0x20a   :  { %v365_v19 = vadd.f32 %v524_v38, %v364_v18 }
 0x20c   :  { %v382_v20 = vmax.f32 %v365_v19, 0.0 }
 0x20e   :  { %463 = vmatmul.f32.gmra.mxu3 %v382_v20 }
 0x219   :  { %v419_v22 = vpop.f32.mrf.mxu3 }
 0x21a   :  { %v420_v23 = vadd.f32 %v525_v21, %v419_v22 }
 0x21c   :  { %467 = vst [vmem:[#allocation5] sm:$0xff] %v420_v23 }
 0x221   :  { %v422_v24 = vpop.f32.mrf.mxu3 }
 0x222   :  { %v423_v25 = vadd.f32 %v525_v21, %v422_v24 }
 0x224   :  { %468 = vst [vmem:[#allocation5 + $0x8] sm:$0xff] %v423_v25 }
 0x229   :  { %v425_v26 = vpop.f32.mrf.mxu3 }
 0x22a   :  { %v426_v27 = vadd.f32 %v525_v21, %v425_v26 }
 0x22c   :  { %469 = vst [vmem:[#allocation5 + $0x10] sm:$0xff] %v426_v27 }
 0x231   :  { %v428_v28 = vpop.f32.mrf.mxu3 }
 0x232   :  { %v429_v29 = vadd.f32 %v525_v21, %v428_v28 }
 0x234   :  { %470 = vst [vmem:[#allocation5 + $0x18] sm:$0xff] %v429_v29 }
 0x239   :  { %v431_v30 = vpop.f32.mrf.mxu3 }
 0x23a   :  { %v432_v31 = vadd.f32 %v525_v21, %v431_v30 }
 0x23c   :  { %471 = vst [vmem:[#allocation5 + $0x20] sm:$0xff] %v432_v31 }
 0x241   :  { %v434_v32 = vpop.f32.mrf.mxu3 }
 0x242   :  { %v435_v33 = vadd.f32 %v525_v21, %v434_v32 }
 0x244   :  { %472 = vst [vmem:[#allocation5 + $0x28] sm:$0xff] %v435_v33 }
 0x249   :  { %v437_v35 = vpop.f32.mrf.mxu3 }
 0x24a   :  { %v438_v37 = vadd.f32 %v525_v21, %v437_v35 }
 0x24c   :  { %473 = vst [vmem:[#allocation5 + $0x30] sm:$0xff] %v438_v37 }
 0x251   :  { %v440_v38 = vpop.f32.mrf.mxu3 }
 0x252   :  { %v441_v39 = vadd.f32 %v525_v21, %v440_v38 }
 0x254   :  { %474 = vst [vmem:[#allocation5 + $0x38] sm:$0xff] %v441_v39 }
 0x259   :  { %v443_v40 = vpop.f32.mrf.mxu3 }
 0x25a   :  { %v444_v41 = vadd.f32 %v525_v21, %v443_v40 }
 0x25c   :  { %475 = vst [vmem:[#allocation5 + $0x40] sm:$0xff] %v444_v41 }
 0x261   :  { %v446_v42 = vpop.f32.mrf.mxu3 }
 0x262   :  { %v447_v43 = vadd.f32 %v525_v21, %v446_v42 }
 0x264   :  { %476 = vst [vmem:[#allocation5 + $0x48] sm:$0xff] %v447_v43 }
 0x269   :  { %v449_v34 = vpop.f32.mrf.mxu3 }
 0x26a   :  { %v450_v44 = vadd.f32 %v525_v21, %v449_v34 }
 0x26c   :  { %477 = vst [vmem:[#allocation5 + $0x50] sm:$0xff] %v450_v44 }
 0x271   :  { %v452_v45 = vpop.f32.mrf.mxu3 }
 0x272   :  { %v453_v46 = vadd.f32 %v525_v21, %v452_v45 }
 0x274   :  { %478 = vst [vmem:[#allocation5 + $0x58] sm:$0xff] %v453_v46 }
 0x279   :  { %v455_v47 = vpop.f32.mrf.mxu3 }
 0x27a   :  { %v456_v36 = vadd.f32 %v525_v21, %v455_v47 }
 0x27c   :  { %479 = vst [vmem:[#allocation5 + $0x60] sm:$0xff] %v456_v36 }
 0x281   :  { %v458_v48 = vpop.f32.mrf.mxu3 }
 0x282   :  { %v459_v49 = vadd.f32 %v525_v21, %v458_v48 }
 0x284   :  { %480 = vst [vmem:[#allocation5 + $0x68] sm:$0xff] %v459_v49 }
 0x289   :  { %v461_v50 = vpop.f32.mrf.mxu3 }
 0x28a   :  { %v462_v51 = vadd.f32 %v525_v21, %v461_v50 }
 0x28c   :  { %481 = vst [vmem:[#allocation5 + $0x70] sm:$0xff] %v462_v51 }
 0x291   :  { %v464_v52 = vpop.f32.mrf.mxu3 }
 0x292   :  { %v465_v53 = vadd.f32 %v525_v21, %v464_v52 }
 0x294   :  { %482 = vst [vmem:[#allocation5 + $0x78] sm:$0xff] %v465_v53 }
 0x295   :  { %495 = dma.vmem_to_hbm [thread:$0]  %s488_s11, 2048, %s490_s14, [#allocation4], %s579_s20, %s579_s20, %s580_s21  }
 0x296   :  { %576 = dma.done.wait [#allocation4], 2048  }
 0x297   :  { %577 = vsyncadd [#allocation4], 4294965248 }
 0x298   :  { %500 = vsyncpa [#allocation3], 1 }
 0x299   :  { %501 = vsyncpa [#allocation4], 1 }

</bundles_post_ra>
